<compile_context>
chip_gen: v7x
topology: tpu7x:2x2x1
jax: 0.10.0
libtpu: 0.0.40
codegen_flags: <defaults>
</compile_context>

<pallas_src>
import jax
import jax.numpy as jnp
from jax.experimental import pallas as pl
from jax.experimental.pallas import tpu as pltpu


_LANE = 128
_SUBLANE = 8
_TARGET_TILE_BYTES = 2 * 1024 * 1024  # ~2 MiB per input buffer


def _projection_kernel(x_ref, w_ref, b_ref, o_ref):
    # x_ref: (TILE, CP) VMEM;  w_ref: (CP, P) VMEM (grid-resident);
    # b_ref: (1, 1) SMEM scalar;  o_ref: (TILE, P) VMEM.
    proj = jnp.dot(x_ref[...], w_ref[...], preferred_element_type=jnp.float32)
    o_ref[...] = (proj + b_ref[0, 0]).astype(o_ref.dtype)


def deep_context_weighter(x, weight, bias):
    """x: [..., C]; weight: (1, C) (torch nn.Linear layout); bias: (1,).

    Returns y with shape x.shape[:-1]  (== Linear(C, 1)(x).squeeze(-1)).
    """
    *lead, c = x.shape
    n = 1
    for d in lead:
        n *= d

    # Lane-dense repack: fold `pack` consecutive rows into one 128-wide row,
    # but only when the reshape is free (no wrapper-side HBM copy).
    pack = 1
    if c < _LANE and _LANE % c == 0 and n % (_LANE // c) == 0:
        pack = _LANE // c
    cp = c * pack
    rows = n // pack

    w = weight.reshape(c, 1).astype(x.dtype)             # transpose of (1, C)
    if pack > 1:
        # Block-diagonal weight: (TILE, c*pack) @ (c*pack, pack) computes
        # `pack` independent row-dot-products per packed row.
        w = jnp.kron(jnp.eye(pack, dtype=x.dtype), w)    # (cp, pack)
    b = bias.reshape(1, 1).astype(jnp.float32)

    x2d = x.reshape(rows, cp)                            # contiguous -> free

    # Row tiling: ~2 MiB per input buffer, sublane-aligned.  If everything
    # fits in one block, use block == full array (no (8,128) divisibility
    # needed in that case, no ragged boundary).
    bytes_per_row = max(cp * x.dtype.itemsize, 1)
    tile = max(_SUBLANE,
               (_TARGET_TILE_BYTES // bytes_per_row) // _SUBLANE * _SUBLANE)
    if rows <= tile:
        tile = rows
    grid = (pl.cdiv(rows, tile),)

    out = pl.pallas_call(
        _projection_kernel,
        out_shape=jax.ShapeDtypeStruct((rows, pack), x.dtype),
        grid_spec=pltpu.PrefetchScalarGridSpec(
            num_scalar_prefetch=0,
            grid=grid,
            in_specs=[
                pl.BlockSpec((tile, cp), lambda i: (i, 0)),
                pl.BlockSpec((cp, pack), lambda i: (0, 0)),         # resident
                pl.BlockSpec(memory_space=pltpu.MemorySpace.SMEM),  # bias
            ],
            out_specs=pl.BlockSpec((tile, pack), lambda i: (i, 0)),
        ),
        compiler_params=pltpu.CompilerParams(
            dimension_semantics=("parallel",),
        ),
        cost_estimate=pl.CostEstimate(
            flops=2 * n * c,
            transcendentals=0,
            bytes_accessed=int(x.dtype.itemsize * (n * c + n)
                               + w.size * w.dtype.itemsize
                               + b.size * b.dtype.itemsize),
        ),
    )(x2d, w, b)

    return out.reshape(tuple(lead))


if __name__ == "__main__":
    key = jax.random.PRNGKey(0)
    k_x, k_w, k_b, k_x2 = jax.random.split(key, 4)

    # Small shapes consistent with the module: x is [..., input_channel].
    batch, seq, input_channel = 2, 8, 32
    x = jax.random.normal(k_x, (batch, seq, input_channel), dtype=jnp.float32)

    # Deterministic nn.Linear-style init: U(-1/sqrt(C), 1/sqrt(C)).
    bound = 1.0 / (input_channel ** 0.5)
    weight = jax.random.uniform(
        k_w, (1, input_channel), dtype=jnp.float32, minval=-bound, maxval=bound
    )
    bias = jax.random.uniform(
        k_b, (1,), dtype=jnp.float32, minval=-bound, maxval=bound
    )

    y = deep_context_weighter(x, weight, bias)
    y = jax.block_until_ready(y)

    # Pure-JAX reference check (packed / lane-dense path).
    y_ref = (x @ weight.T + bias).squeeze(-1)
    assert y.shape == (batch, seq)
    assert jnp.allclose(y, y_ref, atol=1e-5, rtol=1e-5)

    # Also exercise the unpacked fallback path (C does not divide 128).
    c2 = 48
    x2 = jax.random.normal(k_x2, (batch, seq, c2), dtype=jnp.float32)
    w2 = weight[:, :1].repeat(1, axis=0) * 0 + jnp.linspace(
        -0.1, 0.1, c2, dtype=jnp.float32
    ).reshape(1, c2)
    y2 = jax.block_until_ready(deep_context_weighter(x2, w2, bias))
    y2_ref = (x2 @ w2.T + bias).squeeze(-1)
    assert y2.shape == (batch, seq)
    assert jnp.allclose(y2, y2_ref, atol=1e-5, rtol=1e-5)

    print("KERNEL_OK")
</pallas_src>

<mosaic_0001>
module attributes {stable_mosaic.version = 11 : i64} {
  func.func @_projection_kernel(%arg0: i32, %arg1: memref<4x128xf32, #tpu.memory_space<vmem>>, %arg2: memref<128x4xf32, #tpu.memory_space<vmem>>, %arg3: memref<1x1xf32, #tpu.memory_space<smem>>, %arg4: memref<4x4xf32, #tpu.memory_space<vmem>>) attributes {dimension_semantics = [#tpu.dimension_semantics<parallel>], iteration_bounds = array<i64: 1>, scalar_prefetch = 0 : i64, scratch_operands = 0 : i64, tpu.core_type = #tpu.core_type<tc>, window_params = [{transform_indices = @transform_0, window_bounds = array<i64: 4, 128>}, {pipeline_mode = #tpu.pipeline_mode<synchronous>, transform_indices = @transform_1, window_bounds = array<i64: 128, 4>}, {transform_indices = @transform_2, window_bounds = array<i64: 1, 1>}, {transform_indices = @transform_3, window_bounds = array<i64: 4, 4>}]} {
    %c0 = arith.constant 0 : index
    %c0_0 = arith.constant 0 : index
    %0 = vector.load %arg1[%c0, %c0_0] : memref<4x128xf32, #tpu.memory_space<vmem>>, vector<4x128xf32>
    %c0_1 = arith.constant 0 : index
    %c0_2 = arith.constant 0 : index
    %1 = vector.load %arg2[%c0_1, %c0_2] : memref<128x4xf32, #tpu.memory_space<vmem>>, vector<128x4xf32>
    %cst = arith.constant dense<0.000000e+00> : vector<4x4xf32>
    %2 = tpu.matmul %0, %1, %cst {dimension_numbers = #tpu.dot_dimension_numbers<[1], [0], [0], [1], [0, 0, 1, 1], [], []>} : vector<4x128xf32>, vector<128x4xf32>, vector<4x4xf32> -> vector<4x4xf32>
    %c0_3 = arith.constant 0 : index
    %c0_4 = arith.constant 0 : index
    %3 = memref.load %arg3[%c0_3, %c0_4] : memref<1x1xf32, #tpu.memory_space<smem>>
    %4 = vector.broadcast %3 : f32 to vector<4x4xf32>
    %5 = arith.addf %2, %4 : vector<4x4xf32>
    %c0_5 = arith.constant 0 : index
    %c0_6 = arith.constant 0 : index
    %6 = vector.load %arg4[%c0_5, %c0_6] : memref<4x4xf32, #tpu.memory_space<vmem>>, vector<4x4xf32>
    tpu.vector_store %arg4[%c0_5, %c0_6], %5 {strides = array<i32>} : memref<4x4xf32, #tpu.memory_space<vmem>>, vector<4x4xf32>,
    return
  }
  func.func @transform_0(%arg0: i32) -> (i32, i32) {
    %c0_i32 = arith.constant 0 : i32
    %c0_i32_0 = arith.constant 0 : i32
    return %arg0, %c0_i32 : i32, i32
  }
  func.func @transform_1(%arg0: i32) -> (i32, i32) {
    %c0_i32 = arith.constant 0 : i32
    %c0_i32_0 = arith.constant 0 : i32
    %c0_i32_1 = arith.constant 0 : i32
    return %c0_i32, %c0_i32_0 : i32, i32
  }
  func.func @transform_2(%arg0: i32) -> (i32, i32) {
    %c0_i32 = arith.constant 0 : i32
    %c0_i32_0 = arith.constant 0 : i32
    %c0_i32_1 = arith.constant 0 : i32
    return %c0_i32, %c0_i32_0 : i32, i32
  }
  func.func @transform_3(%arg0: i32) -> (i32, i32) {
    %c0_i32 = arith.constant 0 : i32
    %c0_i32_0 = arith.constant 0 : i32
    return %arg0, %c0_i32 : i32, i32
  }
}

</mosaic_0001>

<bundles_post_ra>
// kernel: tpu_custom_call.1
= control target key start
LH: loop header
LB: loop body
LE: loop exit
PB: predicated region body
PF: predicated region fallthrough
CT: control target
= control target key end

     0   :  { %v225_v3 = vmov 0.0|0.0   ;;  %vm226_vm0 = vmmov 0   ;;  %v227_v6 = vmov 0.0   ;;  %s315_s0 = inlined_call_operand.vmem [shape: f32[4,128], index: 0, kind: input, shape index: {}]   ;;  %s316_s1 = inlined_call_operand.vmem [shape: f32[128,4], index: 1, kind: input, shape index: {}]   ;;  %s317_s2 = inlined_call_operand.<no memory space> [shape: f32[1,1], index: 2, kind: input, shape index: {}]   ;;  %s318_s3 = inlined_call_operand.hbm [shape: f32[4,4], index: 3, kind: output, shape index: {}]  }
   0x1   :  { %v17_v0 = vld [vmem:[%s316_s1] sm:$0xff]  ;;  %v18_v1 = vld [vmem:[%s316_s1 + $0x8] sm:$0xff]  ;;  %v19_v2 = vld [vmem:[%s316_s1 + $0x10] sm:$0xff]  ;;  %173 = vmatprep.subr.bf16.mxu0 %v225_v3  ;;  %170 = vmatprep.mubr.msk.f32.mxu0 %vm226_vm0, %v227_v6 }
   0x2   :  { %v174_v4 = vpack.c.bf16 %v18_v1, %v17_v0  ;;  %v20_v5 = vld [vmem:[%s316_s1 + $0x18] sm:$0xff]  ;;  %v21_v8 = vld [vmem:[%s316_s1 + $0x20] sm:$0xff]  ;;  %v22_v9 = vld [vmem:[%s316_s1 + $0x28] sm:$0xff] }
   0x3   :  { %v177_v7 = vpack.c.bf16 %v20_v5, %v19_v2 }
   0x4   :  { %175 = vmatpush3.bf16.msra.mxu0 %v174_v4 }
   0x5   :  { %176 = vmatprep.subr.bf16.mxu0 %v225_v3 }
   0x6   :  { %9 = vsyncpa [#allocation4], 0  ;;  %v180_v10 = vpack.c.bf16 %v22_v9, %v21_v8  ;;  %v23_v11 = vld [vmem:[%s316_s1 + $0x30] sm:$0xff]  ;;  %v24_v12 = vld [vmem:[%s316_s1 + $0x38] sm:$0xff]  ;;  %v34_v27 = vstv %s317_s2  ;;  %s228_s21 = smov [#allocation3]   ;;  %vm105_vm1 = vcmask 27648  }
   0x7   :  { %v183_v13 = vpack.c.bf16 %v24_v12, %v23_v11  ;;  %v25_v14 = vld [vmem:[%s316_s1 + $0x40] sm:$0xff]  ;;  %v26_v15 = vld [vmem:[%s316_s1 + $0x48] sm:$0xff]  ;;  %v27_v17 = vld [vmem:[%s316_s1 + $0x50] sm:$0xff]  ;;  %s113_s22 = sshll.u32 %s228_s21, 4  ;;  %s114_s22 = int_to_ptr.vmem [resolvable:$true] %s113_s22 }
   0x8   :  { %178 = vmatpush3.bf16.msra.mxu0 %v177_v7  ;;  %v186_v16 = vpack.c.bf16 %v26_v15, %v25_v14  ;;  %v28_v18 = vld [vmem:[%s316_s1 + $0x58] sm:$0xff]  ;;  %v29_v20 = vld [vmem:[%s316_s1 + $0x60] sm:$0xff]  ;;  %v30_v21 = vld [vmem:[%s316_s1 + $0x68] sm:$0xff]  ;;  %p206_p1 = scmp.lt.s32.totalorder %s114_s22, %s114_s22 }
   0x9   :  { %179 = vmatprep.subr.bf16.mxu0 %v225_v3  ;;  %v189_v19 = vpack.c.bf16 %v28_v18, %v27_v17  ;;  %v192_v22 = vpack.c.bf16 %v30_v21, %v29_v20  ;;  %v31_v23 = vld [vmem:[%s316_s1 + $0x70] sm:$0xff]  ;;  %v32_v24 = vld [vmem:[%s316_s1 + $0x78] sm:$0xff]  ;;  %v16_v26 = vld [vmem:[%s315_s0] sm:$0xf]  ;;  %s201_s1 = scalar_lea.vmem %s114_s22, 64 }
   0xa   :  { %v195_v25 = vpack.c.bf16 %v32_v24, %v31_v23  ;;  %p202_p0 = scmp.ne.s32.totalorder %s114_s22, %s201_s1  ;;  %p207_p2 = scmp.lt.s32.totalorder %s201_s1, %s201_s1 }
   0xc   :  { %181 = vmatpush3.bf16.msra.mxu0 %v180_v10  ;;  %p208_p3 = por %p207_p2, %p206_p1 }
   0xd   :  { %182 = vmatprep.subr.bf16.mxu0 %v225_v3 }
   0xe   :  { %p209_p4 = pnand %p208_p3, %p202_p0 }
  0x10   :  { %184 = vmatpush3.bf16.msra.mxu0 %v183_v13 }
  0x11   :  { %185 = vmatprep.subr.bf16.mxu0 %v225_v3 }
  0x14   :  { %187 = vmatpush3.bf16.msra.mxu0 %v186_v16 }
  0x15   :  { %188 = vmatprep.subr.bf16.mxu0 %v225_v3 }
  0x18   :  { %190 = vmatpush3.bf16.msra.mxu0 %v189_v19 }
  0x19   :  { %191 = vmatprep.subr.bf16.mxu0 %v225_v3 }
  0x1c   :  { %193 = vmatpush3.bf16.msra.mxu0 %v192_v22 }
  0x1d   :  { %194 = vmatprep.subr.bf16.mxu0 %v225_v3 }
  0x20   :  { %196 = vmatpush3.bf16.msra.mxu0 %v195_v25 }
  0x23   :  { %171 = vmatmul.mubr.f32.vlgmr.msra.gmra.mrb[0].mxu0 %v16_v26 }
  0xf6   :  { %v101_v28 = vpop.f32.mrb[0].mxu0 }
  0xf7   :  { %v102_v29 = vadd.f32 %v101_v28, %v34_v27  ;;  %v172_v30 = vpop.f32.mrb[1].mxu0 }
  0xf9   :  { %106 = vst.msk [vmem:[#allocation3] sm:$0xf] %vm105_vm1, %v102_v29 }
  0xfa   :  { %212 = shalt.err (!%p209_p4)
}
  0xfb   :  { %s213_s24 = scalar_lea.hbm %s318_s3, 64 }
  0xfc   :  { %p214_p5 = scmp.ne.s32.totalorder %s318_s3, %s213_s24  ;;  %p217_p6 = scmp.lt.u32.totalorder %s213_s24, %s318_s3 }
  0xfe   :  { %p219_p7 = pnand %p217_p6, %p214_p5 }
 0x100   :  { %222 = shalt.err (!%p219_p7)
}
 0x101   :  { %116 = dma.vmem_to_hbm [thread:$0]  %s114_s22, 64, %s318_s3, [#allocation4]  }
 0x102   :  { %223 = dma.done.wait [#allocation4], 64  }
 0x103   :  { %224 = vsyncadd [#allocation4], 4294967232 }
 0x104   :  { %120 = vsyncpa [#allocation4], 1 }

</bundles_post_ra>
